<compile_context>
chip_gen: v6e
topology: v6e:2x2x1
jax: 0.10.0
libtpu: 0.0.40
codegen_flags: <defaults>
</compile_context>

<pallas_src>
import functools
import math

import jax
import jax.numpy as jnp
from jax.experimental import pallas as pl
from jax.experimental.pallas import tpu as pltpu

_TARGET_BLOCK_TOKENS = 4096             # default cap on tokens per grid step
_MAX_UNROLL = 128                       # store-statement cap (per-row fallback)
_VMEM_FRACTION = 0.60                   # fraction of per-core VMEM for blocks
_VMEM_CAP_FALLBACK = 64 * 1024 * 1024   # v7x per-core size (safe lower bound)


def _round_up(a, m):
    return ((a + m - 1) // m) * m


def _vmem_capacity_bytes():
    """Per-core VMEM capacity; falls back to the smallest current part (v7x)."""
    try:
        info = pltpu.get_tpu_info()
        for attr in ("vmem_capacity_bytes", "vmem_size_bytes", "vmem_bytes"):
            val = getattr(info, attr, None)
            if val:
                return int(val)
    except Exception:
        pass
    return _VMEM_CAP_FALLBACK


def _multi_tensorcore():
    """True on parts where the 'parallel' grid axis is split across cores."""
    try:
        kind = str(jax.devices()[0].device_kind).lower()
    except Exception:
        return False
    return any(tag in kind for tag in ("v7", "v5p", "v4"))


def _patch_expand_kernel(x_ref, w_ref, b_ref, o_ref, *, s, W, X,
                         compute_dtype, split_matmul, reshape_store):
    """Fused linear expand + pixel-shuffle scatter for one block of image rows.

    x_ref: (RH*W, C)        tokens of RH full image rows
    w_ref: (C, N)           N = s*s*c_out (transposed nn.Linear weight)
    b_ref: (1, N)           bias (f32)
    o_ref: (RH, s, W, X)    pixel-shuffled output block, X = s*c_out
    """
    rh = o_ref.shape[0]
    x = x_ref[...]
    if x.dtype != compute_dtype:
        x = x.astype(compute_dtype)
    wt = w_ref[...]                      # already compute dtype: no per-step cast
    b = b_ref[...]                       # (1, N), f32

    if not split_matmul:
        y = jnp.dot(x, wt, preferred_element_type=jnp.float32) + b
        y = y.astype(o_ref.dtype)

    # y[r*W + w, p1*X + p2*c_out + c]  ->  o[r, p1, w, p2*c_out + c]
    for p1 in range(s):                  # static unroll: s statements (usually 2)
        if split_matmul:
            # Per-p1 matmul: live f32 intermediate shrinks s-fold (v7x VMEM).
            slab = jnp.dot(x, wt[:, p1 * X:(p1 + 1) * X],
                           preferred_element_type=jnp.float32)
            slab = (slab + b[:, p1 * X:(p1 + 1) * X]).astype(o_ref.dtype)
        else:
            slab = y[:, p1 * X:(p1 + 1) * X]                 # (RH*W, X)
        if reshape_store:
            # W % 8 == 0: (RH*W, X) -> (RH, W, X) is a pure vreg re-indexing,
            # so the whole p1 plane is written with a single store.
            o_ref[:, p1, :, :] = slab.reshape(rh, W, X)
        else:
            # Small / odd W: per-row stores (known-good path, bounded unroll).
            for r in range(rh):
                o_ref[r, p1, :, :] = slab[r * W:(r + 1) * W, :]


def patch_expand_forward(x, H, W, weight, bias, scale_factor=2,
                         out_dtype=jnp.float32, compute_dtype=jnp.float32,
                         max_block_tokens=None):
    """JAX/Pallas equivalent of PatchExpand.forward.

    x:      (B, L, C) with L == H*W (any float dtype)
    weight: (out_features, in_features)  -- PyTorch nn.Linear convention
    bias:   (out_features,)
    Returns (y, H*s, W*s) with y: (B, (H*s)*(W*s), c_out).

    Defaults (compute_dtype=f32) reproduce the module's autocast-disabled
    .float() math; compute_dtype=bf16 / out_dtype=bf16 are opt-in perf modes.
    """
    B, L, C = x.shape
    assert L == H * W, f"Input feature has wrong size: {L} vs {H * W}"
    s = int(scale_factor)
    N, C_in = weight.shape
    assert C_in == C
    assert N % (s * s) == 0
    c_out = N // (s * s)
    X = s * c_out

    compute_dtype = jnp.dtype(compute_dtype)
    out_dtype = jnp.dtype(out_dtype)
    in_bytes = jnp.dtype(x.dtype).itemsize
    comp_bytes = compute_dtype.itemsize
    out_bytes = out_dtype.itemsize

    BH = B * H
    step = 8 // math.gcd(W, 8)              # ensures (RH * W) % 8 == 0
    reshape_store = (W % 8 == 0)
    split_matmul = (X >= 256 and X % 128 == 0)

    # ---- VMEM working-set accounting (bytes per image row of W tokens) -----
    per_row = W * (
        2 * C * in_bytes                                        # x block (x2 buffers)
        + (C * comp_bytes if compute_dtype != x.dtype else 0)   # in-kernel cast of x
        + N * 4                                                 # f32 matmul result
        + (N * out_bytes if out_dtype != jnp.float32 else 0)    # cast-to-output copy
        + N * out_bytes                                         # slice/reshape temps
        + 2 * N * out_bytes)                                    # out block (x2 buffers)
    fixed = (2 * C * N * comp_bytes                             # weight (2 buffers)
             + 2 * N * 4                                        # bias
             + 2 * 1024 * 1024)                                 # compiler headroom

    vmem_cap = _vmem_capacity_bytes()
    budget = int(vmem_cap * _VMEM_FRACTION)
    rows_vmem = (budget - fixed) // per_row if budget > fixed else 0
    tok_cap = _TARGET_BLOCK_TOKENS if max_block_tokens is None else int(max_block_tokens)
    rows_tok = tok_cap // max(W, 1)
    rows = max(step, min(rows_vmem, rows_tok))
    if not reshape_store:
        rows = min(rows, max(step, _MAX_UNROLL // s))
    RH = max(step, (rows // step) * step)
    RH = min(RH, _round_up(BH, step))

    want_multi = _multi_tensorcore()
    if want_multi and BH > step and pl.cdiv(BH, RH) < 2:
        RH = max(step, _round_up(pl.cdiv(BH, 2), step))
    num_blocks = pl.cdiv(BH, RH)
    if num_blocks > 1:
        # Rebalance blocks / minimize padding (RH stays a multiple of step).
        RH = min(RH, _round_up(pl.cdiv(BH, num_blocks), step))
        num_blocks = pl.cdiv(BH, RH)
    if want_multi and num_blocks > 1 and num_blocks % 2 == 1:
        # Even number of blocks so the parallel axis splits evenly across cores.
        RH_even = max(step, _round_up(pl.cdiv(BH, num_blocks + 1), step))
        if pl.cdiv(BH, RH_even) % 2 == 0:
            RH = RH_even
            num_blocks = pl.cdiv(BH, RH)
    BH_pad = num_blocks * RH

    # ---- operands (no extra full-HBM passes over x) -------------------------
    x2d = x.reshape(BH * W, C)
    pad_rows = (BH_pad - BH) * W
    if pad_rows:
        x2d = jnp.pad(x2d, ((0, pad_rows), (0, 0)))
    w_t = weight.astype(compute_dtype).T                    # (C, N), compute dtype
    b_row = bias.astype(jnp.float32).reshape(1, N)

    vmem_need = fixed + RH * per_row
    vmem_limit = int(min(max(vmem_need + vmem_need // 4, 32 * 1024 * 1024),
                         int(vmem_cap * 0.9)))

    flops = 2 * BH_pad * W * C * N
    bytes_accessed = (BH_pad * W * C * in_bytes + C * N * comp_bytes + N * 4
                      + BH_pad * W * N * out_bytes)

    kernel = functools.partial(
        _patch_expand_kernel, s=s, W=W, X=X, compute_dtype=compute_dtype,
        split_matmul=split_matmul, reshape_store=reshape_store)

    out = pl.pallas_call(
        kernel,
        out_shape=jax.ShapeDtypeStruct((BH_pad, s, W, X), out_dtype),
        grid_spec=pltpu.PrefetchScalarGridSpec(
            num_scalar_prefetch=0,
            grid=(num_blocks,),
            in_specs=[
                pl.BlockSpec((RH * W, C), lambda i: (i, 0)),   # x row-block
                pl.BlockSpec((C, N), lambda i: (0, 0)),        # weight (VMEM-resident)
                pl.BlockSpec((1, N), lambda i: (0, 0)),        # bias row
            ],
            out_specs=pl.BlockSpec((RH, s, W, X), lambda i: (i, 0, 0, 0)),
        ),
        compiler_params=pltpu.CompilerParams(
            dimension_semantics=("parallel",),
            vmem_limit_bytes=vmem_limit,
        ),
        cost_estimate=pl.CostEstimate(
            flops=flops, transcendentals=0, bytes_accessed=bytes_accessed),
    )(x2d, w_t, b_row)

    if pad_rows:
        out = out[:BH]
    # (B*H, s, W, s*c_out) row-major == einops 'b h w (p1 p2 c) -> b (h p1 w p2) c'
    # followed by 'b h w c -> b (h w) c': a pure reshape, no transpose.
    y = out.reshape(B, H * s * W * s, c_out)
    return y, H * s, W * s


# --------------------------------------------------------------------------- #
# Self-test
# --------------------------------------------------------------------------- #
def _reference(x, weight, bias, H, W, s):
    B, L, C = x.shape
    c_out = weight.shape[0] // (s * s)
    y = x.reshape(B * L, C) @ weight.T + bias
    y = y.reshape(B, H, W, s, s, c_out)
    y = jnp.transpose(y, (0, 1, 3, 2, 4, 5))
    return y.reshape(B, H * s * W * s, c_out)


def _run_case(seed, B, H, W, input_dim, output_dim, s, out_dtype,
              max_block_tokens, tol):
    key = jax.random.PRNGKey(seed)
    kx, kw, kb = jax.random.split(key, 3)
    L = H * W
    x = jax.random.normal(kx, (B, L, input_dim), dtype=jnp.float32)
    out_features = output_dim * s ** 2
    # Deterministic synthetic Linear parameters (PyTorch layout: (out, in)).
    weight = jax.random.normal(kw, (out_features, input_dim),
                               dtype=jnp.float32) * 0.02
    bias = jax.random.normal(kb, (out_features,), dtype=jnp.float32) * 0.01

    fwd = jax.jit(functools.partial(patch_expand_forward, scale_factor=s,
                                    out_dtype=out_dtype,
                                    max_block_tokens=max_block_tokens),
                  static_argnames=("H", "W"))
    y, H_out, W_out = fwd(x, H=H, W=W, weight=weight, bias=bias)
    y = jax.block_until_ready(y)

    ref = _reference(x, weight, bias, H, W, s)
    assert y.shape == (B, H * s * W * s, output_dim), y.shape
    assert int(H_out) == H * s and int(W_out) == W * s
    err = float(jnp.max(jnp.abs(y.astype(jnp.float32) - ref)))
    assert err <= tol, f"max abs err {err} > {tol}"


if __name__ == "__main__":
    # Case 1: W not a multiple of 8 -> per-row store fallback; small block cap
    # forces a 2-step grid.
    _run_case(seed=0, B=2, H=4, W=4, input_dim=32, output_dim=16, s=2,
              out_dtype=jnp.float32, max_block_tokens=16, tol=2e-5)
    # Case 2: W multiple of 8 -> single store per p1 (collapsed scatter);
    # small block cap forces several grid steps plus tail padding.
    _run_case(seed=1, B=2, H=8, W=8, input_dim=48, output_dim=24, s=2,
              out_dtype=jnp.float32, max_block_tokens=48, tol=1e-4)
    # Case 3: bf16 output stream (halves the dominant HBM write traffic).
    _run_case(seed=2, B=2, H=8, W=8, input_dim=48, output_dim=24, s=2,
              out_dtype=jnp.bfloat16, max_block_tokens=None, tol=2e-2)
    print("KERNEL_OK")
</pallas_src>

<mosaic_0001>
module attributes {stable_mosaic.version = 11 : i64} {
  func.func @_patch_expand_kernel(%arg0: i32, %arg1: memref<16x32xf32, #tpu.memory_space<vmem>>, %arg2: memref<32x64xf32, #tpu.memory_space<vmem>>, %arg3: memref<1x64xf32, #tpu.memory_space<vmem>>, %arg4: memref<4x2x4x32xf32, #tpu.memory_space<vmem>>) attributes {dimension_semantics = [#tpu.dimension_semantics<parallel>], iteration_bounds = array<i64: 2>, scalar_prefetch = 0 : i64, scratch_operands = 0 : i64, tpu.core_type = #tpu.core_type<tc>, window_params = [{transform_indices = @transform_0, window_bounds = array<i64: 16, 32>}, {pipeline_mode = #tpu.pipeline_mode<synchronous>, transform_indices = @transform_1, window_bounds = array<i64: 32, 64>}, {pipeline_mode = #tpu.pipeline_mode<synchronous>, transform_indices = @transform_2, window_bounds = array<i64: 1, 64>}, {transform_indices = @transform_3, window_bounds = array<i64: 4, 2, 4, 32>}]} {
    %c0 = arith.constant 0 : index
    %c0_0 = arith.constant 0 : index
    %0 = vector.load %arg1[%c0, %c0_0] : memref<16x32xf32, #tpu.memory_space<vmem>>, vector<16x32xf32>
    %c0_1 = arith.constant 0 : index
    %c0_2 = arith.constant 0 : index
    %1 = vector.load %arg2[%c0_1, %c0_2] : memref<32x64xf32, #tpu.memory_space<vmem>>, vector<32x64xf32>
    %c0_3 = arith.constant 0 : index
    %c0_4 = arith.constant 0 : index
    %2 = vector.load %arg3[%c0_3, %c0_4] : memref<1x64xf32, #tpu.memory_space<vmem>>, vector<1x64xf32>
    %cst = arith.constant dense<0.000000e+00> : vector<16x64xf32>
    %3 = tpu.matmul %0, %1, %cst {dimension_numbers = #tpu.dot_dimension_numbers<[1], [0], [0], [1], [0, 0, 1, 1], [], []>} : vector<16x32xf32>, vector<32x64xf32>, vector<16x64xf32> -> vector<16x64xf32>
    %4 = vector.broadcast %2 : vector<1x64xf32> to vector<16x64xf32>
    %5 = arith.addf %3, %4 : vector<16x64xf32>
    %6 = vector.extract_strided_slice %5 {offsets = [0, 0], sizes = [16, 32], strides = [1, 1]} : vector<16x64xf32> to vector<16x32xf32>
    %7 = vector.extract_strided_slice %6 {offsets = [0, 0], sizes = [4, 32], strides = [1, 1]} : vector<16x32xf32> to vector<4x32xf32>
    %c0_5 = arith.constant 0 : index
    %c0_6 = arith.constant 0 : index
    %c0_7 = arith.constant 0 : index
    %c0_8 = arith.constant 0 : index
    %8 = vector.load %arg4[%c0_5, %c0_6, %c0_7, %c0_8] : memref<4x2x4x32xf32, #tpu.memory_space<vmem>>, vector<1x1x4x32xf32>
    %9 = vector.shape_cast %8 : vector<1x1x4x32xf32> to vector<4x32xf32>
    %10 = vector.shape_cast %7 : vector<4x32xf32> to vector<1x1x4x32xf32>
    tpu.vector_store %arg4[%c0_5, %c0_6, %c0_7, %c0_8], %10 {strides = array<i32>} : memref<4x2x4x32xf32, #tpu.memory_space<vmem>>, vector<1x1x4x32xf32>,
    %11 = vector.extract_strided_slice %6 {offsets = [4, 0], sizes = [4, 32], strides = [1, 1]} : vector<16x32xf32> to vector<4x32xf32>
    %c1 = arith.constant 1 : index
    %c0_9 = arith.constant 0 : index
    %c0_10 = arith.constant 0 : index
    %c0_11 = arith.constant 0 : index
    %12 = vector.load %arg4[%c1, %c0_9, %c0_10, %c0_11] : memref<4x2x4x32xf32, #tpu.memory_space<vmem>>, vector<1x1x4x32xf32>
    %13 = vector.shape_cast %12 : vector<1x1x4x32xf32> to vector<4x32xf32>
    %14 = vector.shape_cast %11 : vector<4x32xf32> to vector<1x1x4x32xf32>
    tpu.vector_store %arg4[%c1, %c0_9, %c0_10, %c0_11], %14 {strides = array<i32>} : memref<4x2x4x32xf32, #tpu.memory_space<vmem>>, vector<1x1x4x32xf32>,
    %15 = vector.extract_strided_slice %6 {offsets = [8, 0], sizes = [4, 32], strides = [1, 1]} : vector<16x32xf32> to vector<4x32xf32>
    %c2 = arith.constant 2 : index
    %c0_12 = arith.constant 0 : index
    %c0_13 = arith.constant 0 : index
    %c0_14 = arith.constant 0 : index
    %16 = vector.load %arg4[%c2, %c0_12, %c0_13, %c0_14] : memref<4x2x4x32xf32, #tpu.memory_space<vmem>>, vector<1x1x4x32xf32>
    %17 = vector.shape_cast %16 : vector<1x1x4x32xf32> to vector<4x32xf32>
    %18 = vector.shape_cast %15 : vector<4x32xf32> to vector<1x1x4x32xf32>
    tpu.vector_store %arg4[%c2, %c0_12, %c0_13, %c0_14], %18 {strides = array<i32>} : memref<4x2x4x32xf32, #tpu.memory_space<vmem>>, vector<1x1x4x32xf32>,
    %19 = vector.extract_strided_slice %6 {offsets = [12, 0], sizes = [4, 32], strides = [1, 1]} : vector<16x32xf32> to vector<4x32xf32>
    %c3 = arith.constant 3 : index
    %c0_15 = arith.constant 0 : index
    %c0_16 = arith.constant 0 : index
    %c0_17 = arith.constant 0 : index
    %20 = vector.load %arg4[%c3, %c0_15, %c0_16, %c0_17] : memref<4x2x4x32xf32, #tpu.memory_space<vmem>>, vector<1x1x4x32xf32>
    %21 = vector.shape_cast %20 : vector<1x1x4x32xf32> to vector<4x32xf32>
    %22 = vector.shape_cast %19 : vector<4x32xf32> to vector<1x1x4x32xf32>
    tpu.vector_store %arg4[%c3, %c0_15, %c0_16, %c0_17], %22 {strides = array<i32>} : memref<4x2x4x32xf32, #tpu.memory_space<vmem>>, vector<1x1x4x32xf32>,
    %23 = vector.extract_strided_slice %5 {offsets = [0, 32], sizes = [16, 32], strides = [1, 1]} : vector<16x64xf32> to vector<16x32xf32>
    %24 = vector.extract_strided_slice %23 {offsets = [0, 0], sizes = [4, 32], strides = [1, 1]} : vector<16x32xf32> to vector<4x32xf32>
    %c0_18 = arith.constant 0 : index
    %c1_19 = arith.constant 1 : index
    %c0_20 = arith.constant 0 : index
    %c0_21 = arith.constant 0 : index
    %25 = vector.load %arg4[%c0_18, %c1_19, %c0_20, %c0_21] : memref<4x2x4x32xf32, #tpu.memory_space<vmem>>, vector<1x1x4x32xf32>
    %26 = vector.shape_cast %25 : vector<1x1x4x32xf32> to vector<4x32xf32>
    %27 = vector.shape_cast %24 : vector<4x32xf32> to vector<1x1x4x32xf32>
    tpu.vector_store %arg4[%c0_18, %c1_19, %c0_20, %c0_21], %27 {strides = array<i32>} : memref<4x2x4x32xf32, #tpu.memory_space<vmem>>, vector<1x1x4x32xf32>,
    %28 = vector.extract_strided_slice %23 {offsets = [4, 0], sizes = [4, 32], strides = [1, 1]} : vector<16x32xf32> to vector<4x32xf32>
    %c1_22 = arith.constant 1 : index
    %c1_23 = arith.constant 1 : index
    %c0_24 = arith.constant 0 : index
    %c0_25 = arith.constant 0 : index
    %29 = vector.load %arg4[%c1_22, %c1_23, %c0_24, %c0_25] : memref<4x2x4x32xf32, #tpu.memory_space<vmem>>, vector<1x1x4x32xf32>
    %30 = vector.shape_cast %29 : vector<1x1x4x32xf32> to vector<4x32xf32>
    %31 = vector.shape_cast %28 : vector<4x32xf32> to vector<1x1x4x32xf32>
    tpu.vector_store %arg4[%c1_22, %c1_23, %c0_24, %c0_25], %31 {strides = array<i32>} : memref<4x2x4x32xf32, #tpu.memory_space<vmem>>, vector<1x1x4x32xf32>,
    %32 = vector.extract_strided_slice %23 {offsets = [8, 0], sizes = [4, 32], strides = [1, 1]} : vector<16x32xf32> to vector<4x32xf32>
    %c2_26 = arith.constant 2 : index
    %c1_27 = arith.constant 1 : index
    %c0_28 = arith.constant 0 : index
    %c0_29 = arith.constant 0 : index
    %33 = vector.load %arg4[%c2_26, %c1_27, %c0_28, %c0_29] : memref<4x2x4x32xf32, #tpu.memory_space<vmem>>, vector<1x1x4x32xf32>
    %34 = vector.shape_cast %33 : vector<1x1x4x32xf32> to vector<4x32xf32>
    %35 = vector.shape_cast %32 : vector<4x32xf32> to vector<1x1x4x32xf32>
    tpu.vector_store %arg4[%c2_26, %c1_27, %c0_28, %c0_29], %35 {strides = array<i32>} : memref<4x2x4x32xf32, #tpu.memory_space<vmem>>, vector<1x1x4x32xf32>,
    %36 = vector.extract_strided_slice %23 {offsets = [12, 0], sizes = [4, 32], strides = [1, 1]} : vector<16x32xf32> to vector<4x32xf32>
    %c3_30 = arith.constant 3 : index
    %c1_31 = arith.constant 1 : index
    %c0_32 = arith.constant 0 : index
    %c0_33 = arith.constant 0 : index
    %37 = vector.load %arg4[%c3_30, %c1_31, %c0_32, %c0_33] : memref<4x2x4x32xf32, #tpu.memory_space<vmem>>, vector<1x1x4x32xf32>
    %38 = vector.shape_cast %37 : vector<1x1x4x32xf32> to vector<4x32xf32>
    %39 = vector.shape_cast %36 : vector<4x32xf32> to vector<1x1x4x32xf32>
    tpu.vector_store %arg4[%c3_30, %c1_31, %c0_32, %c0_33], %39 {strides = array<i32>} : memref<4x2x4x32xf32, #tpu.memory_space<vmem>>, vector<1x1x4x32xf32>,
    return
  }
  func.func @transform_0(%arg0: i32) -> (i32, i32) {
    %c0_i32 = arith.constant 0 : i32
    %c0_i32_0 = arith.constant 0 : i32
    return %arg0, %c0_i32 : i32, i32
  }
  func.func @transform_1(%arg0: i32) -> (i32, i32) {
    %c0_i32 = arith.constant 0 : i32
    %c0_i32_0 = arith.constant 0 : i32
    %c0_i32_1 = arith.constant 0 : i32
    return %c0_i32, %c0_i32_0 : i32, i32
  }
  func.func @transform_2(%arg0: i32) -> (i32, i32) {
    %c0_i32 = arith.constant 0 : i32
    %c0_i32_0 = arith.constant 0 : i32
    %c0_i32_1 = arith.constant 0 : i32
    return %c0_i32, %c0_i32_0 : i32, i32
  }
  func.func @transform_3(%arg0: i32) -> (i32, i32, i32, i32) {
    %c0_i32 = arith.constant 0 : i32
    %c0_i32_0 = arith.constant 0 : i32
    %c0_i32_1 = arith.constant 0 : i32
    %c0_i32_2 = arith.constant 0 : i32
    return %arg0, %c0_i32, %c0_i32_0, %c0_i32_1 : i32, i32, i32, i32
  }
}

</mosaic_0001>

<bundles_post_ra>
// kernel: patch_expand_forward.1
= control target key start
LH: loop header
LB: loop body
LE: loop exit
PB: predicated region body
PF: predicated region fallthrough
CT: control target
= control target key end

     0   :  { %8 = vsyncpa [#allocation3], 0  ;;  %s766_s0 = inlined_call_operand.hbm [shape: f32[32,32], index: 0, kind: input, shape index: {}]   ;;  %s767_s1 = inlined_call_operand.hbm [shape: f32[32,64], index: 1, kind: input, shape index: {}]   ;;  %s768_s2 = inlined_call_operand.vmem [shape: f32[1,64], index: 2, kind: input, shape index: {}]   ;;  %s769_s3 = inlined_call_operand.vmem [shape: f32[8,2,4,32], index: 3, kind: output, shape index: {}]  }
   0x1   :  { %10 = vsyncpa [#allocation3 + $0x1], 0 }
   0x2   :  { %11 = vsyncpa [#allocation5], 0  ;;  %s626_s12 = smov 0   ;;  %s628_s13 = smov 0  }
   0x3   :  { %s630_s14 = smov 0   ;;  %s632_s15 = smov 0  }
   0x4 LB: > { %s409_s16 = sadd.s32 4294967295, %s599_s15   ;;  %p37_p0 = scmp.ne.s32.totalorder %s591_s13, %s587_s12  ;;  %s599_s15 = sphi %s632_s15, %s785_s15   ;;  %s595_s14 = sphi %s630_s14, %s784_s14   ;;  %s591_s13 = sphi %s628_s13, %s783_s13   ;;  %s587_s12 = sphi %s626_s12, %s782_s12  }
   0x5   : > { %p648_p1 = scmp.eq.s32.totalorder %s409_s16, 0  ;;  %p411_p2 = scmp.ge.s32.totalorder %s599_s15, 1 }
   0x6   : > { %p116_p3 = scmp.lt.s32.totalorder %s599_s15, 3  ;;  %s601_s20 = smov [#allocation4]  }
   0x7   : > { %s774_s17 = scalar_select %p648_p1, 1, 0 }
   0x8   : > { %p656_p4 = por %p648_p1, %p37_p0  ;;  %p660_p5 = pnand %p411_p2, %p116_p3 }
   0x9   : > { %s128_s21 = sshll.u32 %s601_s20, 4  ;;  %s673_s23 = sadd.s32 1, %s599_s15   ;;  %s129_s21 = int_to_ptr.vmem [resolvable:$true] %s128_s21 }
   0xa   : > { %s775_s18 = scalar_select %p656_p4, 1, 0 }
   0xb   : > { %s776_s19 = scalar_select %p660_p5, 1, 0 }
   0xc   : > { %p460_p6 = pneg %p660_p5  ;;  %s24_s24 = sadd.s32 1, %s595_s14 }
   0xd   : > { %s21_s25 = ssub.s32 %s599_s15, %s673_s23  ;;  %s518_s26 = scalar_lea.vmem %s129_s21, 512 }
   0xe   : > { %p668_p7 = pnand %p460_p6, %p648_p1  ;;  %p519_p9 = scmp.ne.s32.totalorder %s129_s21, %s518_s26 }
   0xf   : > { %p526_p12 = scmp.lt.s32.totalorder %s129_s21, %s129_s21  ;;  %p527_p13 = scmp.lt.s32.totalorder %s518_s26, %s518_s26 }
  0x10   : > { %p509_p8 = pneg %p668_p7 }
  0x11   : > { %p528_p0 = por %p527_p13, %p526_p12 }
  0x12   : > { %p521_p10 = pnand %p519_p9, %p509_p8 }
  0x14   : > { %p522_p11 = pneg %p521_p10 }
  0x16   : > { %p529_p2 = pnand %p528_p0, %p522_p11 }
  0x18   : > { %532 = shalt.err (!%p529_p2)
}
  0x19   : > { %s602_s27 = smov 128   ;;  %s603_s28 = smov 8  }
  0x1a   : > { %463 = dma.hbm_to_vmem [thread:$0]  (!%p668_p7), %s767_s1, 512, %s129_s21, [#allocation5], %s602_s27, %s602_s27, %s603_s28  }
  0x1b   : > { %p22_p3 = scmp.eq.s32.totalorder %s21_s25, 0  ;;  %p31_p6 = scmp.ne.s32.totalorder %s595_s14, %s591_s13 }
  0x1c   : > { %p32_p8 = scmp.eq.s32.totalorder %s599_s15, 0  ;;  %p469_p9 = scmp.lt.s32.totalorder %s599_s15, 2 }
  0x1d   : > { %s693_s4 = scalar_select %p22_p3, %s595_s14, %s24_s24  }
  0x1e   : > { %p33_p10 = por %p32_p8, %p31_p6  ;;  %s145_s5 = sand.u32 1, %s595_s14  }
  0x1f   : > { %s414_s6 = sshll.u32 %s145_s5, 4  ;;  %s435_s7 = sshll.u32 %s599_s15, 8 }
  0x20   : > { %s700_s10 = scalar_lea.hbm %s766_s0, %s435_s7  ;;  %s149_s11 = scalar_lea.vmem [#allocation2], %s414_s6 }
  0x21   : > { %s156_s12 = sshll.u32 %s149_s11, 4  ;;  %p704_p7 = pnand %p469_p9, %p33_p10  ;;  %s702_s12 = int_to_ptr.vmem [resolvable:$true] %s156_s12 }
  0x22   : > { %s708_s21 = scalar_lea.sflag [#allocation3], %s145_s5  ;;  %s533_s22 = scalar_lea.hbm %s700_s10, 256 }
  0x23   : > { %p534_p11 = scmp.ne.s32.totalorder %s700_s10, %s533_s22  ;;  %p535_p12 = pneg %p704_p7 }
  0x24   : > { %s538_s26 = scalar_lea.hbm %s766_s0, 512  ;;  %p539_p2 = scmp.lt.s32.totalorder %s700_s10, %s766_s0 }
  0x25   : > { %p536_p13 = pnand %p535_p12, %p534_p11  ;;  %p540_p3 = scmp.lt.s32.totalorder %s538_s26, %s533_s22 }
  0x27   : > { %p537_p0 = pneg %p536_p13  ;;  %p541_p6 = por %p540_p3, %p539_p2 }
  0x29   : > { %p542_p8 = pnand %p541_p6, %p537_p0 }
  0x2b   : > { %545 = shalt.err (!%p542_p8)
}
  0x2c   : > { %s546_s5 = scalar_lea.vmem %s702_s12, 256  ;;  %s604_s6 = smov [#allocation2]  }
  0x2d   : > { %p547_p9 = scmp.ne.s32.totalorder %s702_s12, %s546_s5  ;;  %s551_s7 = sshll.u32 %s604_s6, 4  ;;  %s552_s7 = int_to_ptr.vmem [resolvable:$false] %s551_s7 }
  0x2e   : > { %s553_s8 = scalar_lea.vmem %s552_s7, 512  ;;  %p554_p13 = scmp.lt.s32.totalorder %s702_s12, %s552_s7 }
  0x2f   : > { %p549_p10 = pnand %p547_p9, %p535_p12  ;;  %p555_p1 = scmp.lt.s32.totalorder %s553_s8, %s546_s5 }
  0x31   : > { %p550_p11 = pneg %p549_p10  ;;  %p556_p4 = por %p555_p1, %p554_p13 }
  0x33   : > { %p557_p5 = pnand %p556_p4, %p550_p11 }
  0x35   : > { %560 = shalt.err (!%p557_p5)
}
  0x36   : > { %467 = dma.hbm_to_vmem [thread:$0]  (!%p704_p7), %s700_s10, 256, %s702_s12, %s708_s21, %s602_s27, %s602_s27, %s603_s28  }
  0x37   : > { %p779_p12 = scmp.ne.s32.totalorder %s776_s19, 0 }
  0x38   : > { %s170_s9 = sand.u32 (!%p779_p12), 1, %s591_s13   ;;  %p780_p1 = scmp.ne.s32.totalorder (!%p779_p12), %s775_s18, 0 }
  0x39   : > { %168 = sbr.rel (%p779_p12) target bundleno = 393 (0x189), region = 32  ;;  %s418_s11 = sshll.u32 (!%p779_p12), %s170_s9, 4 }
  0x3a   : > { %s171_s22 = scalar_lea.sflag (!%p779_p12), [#allocation3], %s170_s9  ;;  %s174_s24 = scalar_lea.vmem (!%p779_p12), [#allocation2], %s418_s11 }
  0x3e   : > { %578 = dma.done.wait (%p780_p1), %s171_s22, 256  }
  0x3f   : > { %580 = vsyncadd (%p780_p1), %s171_s22, 4294967040  ;;  %p781_p4 = scmp.ne.s32.totalorder %s774_s17, 0 }
  0x41   : > { %582 = dma.done.wait (%p781_p4), [#allocation5], 512  }
  0x42   : > { %584 = vsyncadd (%p781_p4), [#allocation5], 4294966784  ;;  %vm223_vm0 = vcmask 261120   ;;  %v215_v0 = vld [vmem:[#allocation4 + $0x18] sm:$0xff]  ;;  %v214_v1 = vld [vmem:[#allocation4 + $0x10] sm:$0xff]  ;;  %s420_s17 = sshll.u32 %s409_s16, 2 }
  0x43   : > { %443 = vmatprep.subr.mxu0 %v215_v0  ;;  %v210_v2 = vld [vmem:[%s174_s24] sm:$0xff]  ;;  %v213_v3 = vld [vmem:[#allocation4 + $0x8] sm:$0xff]  ;;  %p204_p5 = scmp.lt.s32.totalorder %s420_s17, 7  ;;  %vm305_vm1 = vcmask 257024   ;;  %vm308_vm2 = vcmask 261124   ;;  %s605_s20 = smov 96  }
  0x44   : > { %444 = vmatpush3.msra.mxu0 %v215_v0  ;;  %451 = vmatprep.mubr.msk.f32.mxu0 %vm223_vm0, %v210_v2  ;;  %v212_v4 = vld [vmem:[#allocation4] sm:$0xff]  ;;  %v211_v5 = vld [vmem:[%s174_s24 + $0x8] sm:$0xff] }
  0x45   : > { %445 = vmatprep.subr.mxu0 %v214_v1  ;;  %s787_s17 = smov (!%p204_p5, %s420_s17), 7  ;;  %v423_v7 = vld [vmem:[%s768_s2] ss:$0 sm:$0xff] }
  0x46   : > { %446 = vmatpush3.msra.mxu0 %v214_v1  ;;  %s436_s18 = sshll.u32 %s787_s17, 3 }
  0x47   : > { %447 = vmatprep.subr.mxu0 %v213_v3  ;;  %s208_s12 = scalar_lea.vmem %s769_s3, %s436_s18 }
  0x48   : > { %448 = vmatpush3.msra.mxu0 %v213_v3 }
  0x49   : > { %449 = vmatprep.subr.mxu0 %v212_v4 }
  0x4a   : > { %450 = vmatpush3.msra.mxu0 %v212_v4 }
  0x4b   : > { %452 = vmatmul.mubr.msk.f32.vlgmr.msra.gmra.mxu0 %vm223_vm0, %v211_v5 }
 0x10b   : > { %v453_v6 = vpop.f32.mrf.mxu0 }
 0x10c   : > { %v302_v10 = vadd.f32 %v453_v6, %v423_v7 }
 0x10d   : > { %v296_v8 = vpop.f32.mrf.mxu0 }
 0x10e   : > { %v297_v9 = vadd.f32 %v423_v7, %v296_v8  ;;  %427 = vst.msk [vmem:[%s208_s12 + $0x10] sm:$0xf] %vm305_vm1, %v302_v10 }
 0x10f   : > { %428 = vst.msk [vmem:[%s208_s12 + $0x14] sm:$0xf0] %vm308_vm2, %v302_v10 }
 0x110   : > { %315 = vrot.lane.b32.xlu0 %v297_v9, %s605_s20  ;;  %306 = vst.msk [vmem:[%s208_s12] sm:$0xf] %vm305_vm1, %v297_v9 }
 0x111   : > { %426 = vst.msk [vmem:[%s208_s12 + $0x4] sm:$0xf0] %vm308_vm2, %v297_v9 }
 0x114   : > { %323 = vrot.lane.b32.xlu0 %v302_v10, %s605_s20 }
 0x182   : > { %v316_v11 = vpop.permute.xlu0 %315 }
 0x183   : > { %429 = vst.msk [vmem:[%s208_s12 + $0x4] sm:$0xf] %vm305_vm1, %v316_v11 }
 0x184   : > { %430 = vst.msk [vmem:[%s208_s12 + $0x8] sm:$0xf0] %vm308_vm2, %v316_v11 }
 0x186   : > { %v324_v12 = vpop.permute.xlu0 %323 }
 0x187   : > { %431 = vst.msk [vmem:[%s208_s12 + $0x14] sm:$0xf] %vm305_vm1, %v324_v12 }
 0x188   : > { %432 = vst.msk [vmem:[%s208_s12 + $0x18] sm:$0xf0] %vm308_vm2, %v324_v12 }
 0x189 PF: > { %p14_p7 = scmp.ge.s32.totalorder %s673_s23, 4   ;;  %s782_s12 = smov %s591_s13 }
 0x18a   : > { %s783_s13 = smov %s595_s14  ;;  %s784_s14 = smov %s693_s4 }
 0x18b   : > { %s785_s15 = smov %s673_s23  ;;  %16 = sbr.rel (!%p14_p7) target bundleno = 4 (0x4), region = 83 }
 0x190   :  { %354 = vsyncpa [#allocation3], 1 }
 0x191   :  { %356 = vsyncpa [#allocation3 + $0x1], 1 }
 0x192   :  { %357 = vsyncpa [#allocation5], 1 }

</bundles_post_ra>
